<compile_context>
chip_gen: v5e
topology: v5e:2x2
jax: 0.10.0
libtpu: 0.0.40
codegen_flags: <defaults>
</compile_context>

<pallas_src>
import jax
import jax.numpy as jnp
from jax.experimental import pallas as pl
from jax.experimental.pallas import tpu as pltpu


# ---------------------------------------------------------------------------
# In-kernel helpers
# ---------------------------------------------------------------------------

def _split3(t):
    """Exact-ish 3-way bf16 decomposition of an f32 tensor (residual ~2^-24).

    The selection matrices below have entries in {0, +-1, 0.5} (exact in bf16)
    and the MXU accumulates in f32, so gathers built from these parts are
    f32-accurate.  A 2-part split would save one MXU pass per gather but its
    ~2^-16 residual is at the edge of the 1e-5 tolerance, so p2 is kept.
    """
    p0 = t.astype(jnp.bfloat16)
    r1 = t - p0.astype(jnp.float32)
    p1 = r1.astype(jnp.bfloat16)
    p2 = (r1 - p1.astype(jnp.float32)).astype(jnp.bfloat16)
    return (p0, p1, p2)


def _gather(parts, sel):
    acc = jnp.dot(parts[0], sel, preferred_element_type=jnp.float32)
    acc = acc + jnp.dot(parts[1], sel, preferred_element_type=jnp.float32)
    acc = acc + jnp.dot(parts[2], sel, preferred_element_type=jnp.float32)
    return acc


def _attend_store(ll, s, o_ref):
    # nn.Softmax2d == softmax over the channel axis (axis 0 of the block).
    m = jnp.max(s, axis=0, keepdims=True)
    ex = jnp.exp(s - m)
    att = ex / jnp.sum(ex, axis=0, keepdims=True)
    # out = LL + LL * att == LL * (1 + att)
    o_ref[...] = ll * (jnp.float32(1.0) + att)


# ---------------------------------------------------------------------------
# Kernel bodies
# ---------------------------------------------------------------------------

def _wad_kernel_packed(x_ref, sll_ref, ss_ref, o_ref):
    """Fallback path (small / non-128-aligned W): single packed input block.

    x_ref : (C, TH, 2W)   lanes [0, W) = input row 2h, lanes [W, 2W) = row 2h+1
    sll_ref: (2W, Wh) bf16, 0.5 at rows {2m, 2m+1, W+2m, W+2m+1} of column m
    ss_ref : (2W, Wh) bf16, +1 at row 2m, -1 at row W+2m+1
    o_ref  : (C, TH, Wh)
    """
    C, TH, W2 = x_ref.shape
    Wh = o_ref.shape[-1]
    parts = _split3(x_ref[...].reshape(C * TH, W2))
    ll = _gather(parts, sll_ref[...]).reshape(C, TH, Wh)   # 0.5*(a+b+c+d)
    s = _gather(parts, ss_ref[...]).reshape(C, TH, Wh)     # a - d  (== LH+HL)
    _attend_store(ll, s, o_ref)


def _wad_kernel_banded(u_ref, v_ref, sp_ref, se_ref, o_ref):
    """Banded path (W % 256 == 0): MXU reduction length is O(band), not O(W).

    u_ref : (C, TH, 2*TW) even input rows, this band's input columns
    v_ref : (C, TH, 2*TW) odd  input rows, same columns
    sp_ref: (2*TW, TW) bf16, 0.5 at rows {2m, 2m+1} of column m (half pair-sum)
    se_ref: (2*TW, TW) bf16, 1.0 at row 2m of column m (even-column select)
    o_ref : (C, TH, TW)
    """
    C, TH, L = u_ref.shape
    TW = o_ref.shape[-1]
    u = u_ref[...].reshape(C * TH, L)
    v = v_ref[...].reshape(C * TH, L)
    wp = _split3(u + v)          # pre-add on the VPU halves the LL MXU work
    vp = _split3(v)
    sp = sp_ref[...]
    se = se_ref[...]
    ll = _gather(wp, sp)         # 0.5*((a+c) + (b+d)) == LL
    ew = _gather(wp, se)         # a + c
    pv = _gather(vp, sp)         # 0.5*(c + d)
    s = ew - (pv + pv)           # (a + c) - (c + d) = a - d == LH + HL
    _attend_store(ll.reshape(C, TH, TW), s.reshape(C, TH, TW), o_ref)


# ---------------------------------------------------------------------------
# Host-side wrapper
# ---------------------------------------------------------------------------

def _vmem_budgets():
    """(resident-footprint budget, vmem_limit_bytes) per TPU generation."""
    kind = ""
    try:
        kind = jax.devices()[0].device_kind.lower()
    except Exception:
        pass
    if "v7" in kind or "7x" in kind:
        return 14 * 2**20, 32 * 2**20      # v7x: 64 MiB VMEM, 2 TensorCores
    return 24 * 2**20, 48 * 2**20          # v5e / v6e: 128 MiB VMEM


def _pick_th(Hh, per_row_bytes, fixed_bytes, budget_bytes, max_th=None):
    """Largest legal row-tile (multiple of 8 sublanes, or full Hh) whose
    estimated resident footprint fits the budget."""
    cands = [t for t in range(Hh, 0, -1)
             if Hh % t == 0 and (t % 8 == 0 or t == Hh)]
    if max_th is not None:
        capped = [t for t in cands if t <= max_th]
        cands = capped or cands
    for t in cands:
        if fixed_bytes + t * per_row_bytes <= budget_bytes:
            return t
    # Nothing fits: take the smallest legal tile; if that still exceeds the
    # VMEM limit it fails loudly at compile time rather than silently.
    return cands[-1]


def wad_module2_forward(x, *, band_cols=128):
    """Pallas implementation of wad_module2.forward (wavename='haar').

    x: (N, C, H, W) with even H, W.  Returns (N, C, H//2, W//2) float32.
    """
    # TODO(synk): add a bf16-native path (single-part gather, no host upcast)
    # for callers that supply bf16 activations.
    x = x.astype(jnp.float32)
    N, C, H, W = x.shape
    if H % 2 or W % 2:
        raise ValueError("H and W must be even for the Haar DWT.")
    Hh, Wh = H // 2, W // 2
    budget, vmem_limit = _vmem_budgets()

    # No-copy view: output row h <-> input rows (2h, 2h+1) packed side by side
    # along the lane axis (last dim 2*W stays lane-dense).
    xv = x.reshape(N, C, Hh, 2 * W)

    n_out = N * C * Hh * Wh
    use_banded = (W % (2 * band_cols) == 0)

    if use_banded:
        TW = band_cols                   # output columns per band (lane-dense)
        L = 2 * TW                       # input columns per band
        NB = Wh // TW                    # number of bands

        # Host-built, VMEM-resident selection matrices (exact bf16 values).
        r = jnp.arange(L)[:, None]
        c = jnp.arange(TW)[None, :]
        s_pair = jnp.where((r == 2 * c) | (r == 2 * c + 1), 0.5, 0.0
                           ).astype(jnp.bfloat16)
        s_even = jnp.where(r == 2 * c, 1.0, 0.0).astype(jnp.bfloat16)

        # Resident-footprint model per output row: double-buffered u/v input
        # blocks + bf16 split parts + f32 temporaries + double-buffered output.
        per_row = 96 * C * TW
        fixed = 8 * TW * TW              # selection matrices (with slack)
        # Keep >= 2 grid blocks when possible so v7x's 2 TCs both get work.
        max_th = max(8, Hh // 2) if (N * NB == 1 and Hh >= 16) else None
        TH = _pick_th(Hh, per_row, fixed, budget, max_th)

        grid = (N, Hh // TH, NB)
        in_specs = [
            # even-row slab of band j: lanes [j*L, (j+1)*L) of the packed view
            pl.BlockSpec((None, C, TH, L), lambda n, h, j: (n, 0, h, j)),
            # odd-row slab of band j: lanes [W + j*L, W + (j+1)*L)
            pl.BlockSpec((None, C, TH, L), lambda n, h, j: (n, 0, h, j + NB)),
            pl.BlockSpec((L, TW), lambda n, h, j: (0, 0)),
            pl.BlockSpec((L, TW), lambda n, h, j: (0, 0)),
        ]
        out_spec = pl.BlockSpec((None, C, TH, TW), lambda n, h, j: (n, 0, h, j))
        cost = pl.CostEstimate(
            flops=n_out * (36 * TW + 16),
            transcendentals=n_out,
            bytes_accessed=x.size * 4 + n_out * 4 + 2 * L * TW * 2,
        )
        kernel = _wad_kernel_banded
        operands = (xv, xv, s_pair, s_even)
        dims = ("parallel", "parallel", "parallel")
    else:
        # Fallback for small / irregular W: fused full-width gather (K = 2W).
        r = jnp.arange(2 * W)[:, None]
        c = jnp.arange(Wh)[None, :]
        hit_ll = ((r == 2 * c) | (r == 2 * c + 1) |
                  (r == W + 2 * c) | (r == W + 2 * c + 1))
        s_ll = jnp.where(hit_ll, 0.5, 0.0).astype(jnp.bfloat16)
        s_s = (jnp.where(r == 2 * c, 1.0, 0.0)
               - jnp.where(r == W + 2 * c + 1, 1.0, 0.0)).astype(jnp.bfloat16)

        per_row = 40 * C * W
        fixed = 8 * W * Wh
        max_th = max(8, Hh // 2) if (N == 1 and Hh >= 16) else None
        TH = _pick_th(Hh, per_row, fixed, budget, max_th)

        grid = (N, Hh // TH)
        in_specs = [
            pl.BlockSpec((None, C, TH, 2 * W), lambda n, h: (n, 0, h, 0)),
            pl.BlockSpec((2 * W, Wh), lambda n, h: (0, 0)),
            pl.BlockSpec((2 * W, Wh), lambda n, h: (0, 0)),
        ]
        out_spec = pl.BlockSpec((None, C, TH, Wh), lambda n, h: (n, 0, h, 0))
        cost = pl.CostEstimate(
            flops=n_out * (24 * W + 16),
            transcendentals=n_out,
            bytes_accessed=x.size * 4 + n_out * 4 + 2 * 2 * W * Wh * 2,
        )
        kernel = _wad_kernel_packed
        operands = (xv, s_ll, s_s)
        dims = ("parallel", "parallel")

    out = pl.pallas_call(
        kernel,
        out_shape=jax.ShapeDtypeStruct((N, C, Hh, Wh), jnp.float32),
        grid_spec=pltpu.PrefetchScalarGridSpec(
            num_scalar_prefetch=0,
            grid=grid,
            in_specs=in_specs,
            out_specs=out_spec,
        ),
        compiler_params=pltpu.CompilerParams(
            dimension_semantics=dims,
            vmem_limit_bytes=vmem_limit,
        ),
        cost_estimate=cost,
    )(*operands)

    # TODO(synk): the show_tensor() matplotlib visualization loop in forward()
    # has no compute effect and is intentionally not reproduced.
    return out


# ---------------------------------------------------------------------------
# Pure-JAX reference for validation
# ---------------------------------------------------------------------------

def _reference(x):
    a = x[:, :, 0::2, 0::2]
    b = x[:, :, 0::2, 1::2]
    c = x[:, :, 1::2, 0::2]
    d = x[:, :, 1::2, 1::2]
    ll = (a + b + c + d) * 0.5
    lh = (a - b + c - d) * 0.5
    hl = (a + b - c - d) * 0.5
    att = jax.nn.softmax(lh + hl, axis=1)
    return ll + ll * att


if __name__ == "__main__":
    key = jax.random.PRNGKey(0)
    k1, k2 = jax.random.split(key)

    # Small case (packed fallback path) at the module's nominal small shape.
    x_small = jax.random.normal(k1, (2, 4, 16, 16), dtype=jnp.float32)
    out_small = jax.block_until_ready(wad_module2_forward(x_small))
    ref_small = _reference(x_small)
    assert out_small.shape == (2, 4, 8, 8)
    err_s = float(jnp.max(jnp.abs(out_small - ref_small)))
    assert jnp.allclose(out_small, ref_small, atol=1e-5, rtol=1e-5), (
        f"packed path mismatch: max abs err = {err_s}")

    # Lane-dense banded path (W % 256 == 0).  Tolerance is a touch looser only
    # because of f32 summation-order differences vs the reference.
    x_big = jax.random.normal(k2, (2, 4, 32, 512), dtype=jnp.float32)
    out_big = jax.block_until_ready(wad_module2_forward(x_big))
    ref_big = _reference(x_big)
    assert out_big.shape == (2, 4, 16, 256)
    err_b = float(jnp.max(jnp.abs(out_big - ref_big)))
    assert jnp.allclose(out_big, ref_big, atol=3e-5, rtol=1e-5), (
        f"banded path mismatch: max abs err = {err_b}")

    print("KERNEL_OK")
</pallas_src>

<mosaic_0001>
module attributes {stable_mosaic.version = 11 : i64} {
  func.func @_wad_kernel_packed(%arg0: i32, %arg1: i32, %arg2: memref<1x4x8x32xf32, #tpu.memory_space<vmem>>, %arg3: memref<32x8xbf16, #tpu.memory_space<vmem>>, %arg4: memref<32x8xbf16, #tpu.memory_space<vmem>>, %arg5: memref<1x4x8x8xf32, #tpu.memory_space<vmem>>) attributes {dimension_semantics = [#tpu.dimension_semantics<parallel>, #tpu.dimension_semantics<parallel>], iteration_bounds = array<i64: 2, 1>, scalar_prefetch = 0 : i64, scratch_operands = 0 : i64, tpu.core_type = #tpu.core_type<tc>, window_params = [{transform_indices = @transform_0, window_bounds = array<i64: 1, 4, 8, 32>}, {pipeline_mode = #tpu.pipeline_mode<synchronous>, transform_indices = @transform_1, window_bounds = array<i64: 32, 8>}, {pipeline_mode = #tpu.pipeline_mode<synchronous>, transform_indices = @transform_2, window_bounds = array<i64: 32, 8>}, {transform_indices = @transform_3, window_bounds = array<i64: 1, 4, 8, 8>}]} {
    %c0 = arith.constant 0 : index
    %c0_0 = arith.constant 0 : index
    %c0_1 = arith.constant 0 : index
    %c0_2 = arith.constant 0 : index
    %0 = vector.load %arg2[%c0, %c0_0, %c0_1, %c0_2] : memref<1x4x8x32xf32, #tpu.memory_space<vmem>>, vector<1x4x8x32xf32>
    %1 = vector.shape_cast %0 : vector<1x4x8x32xf32> to vector<4x8x32xf32>
    %2 = vector.shape_cast %1 : vector<4x8x32xf32> to vector<32x32xf32>
    %3 = arith.truncf %2 : vector<32x32xf32> to vector<32x32xbf16>
    %4 = arith.extf %3 : vector<32x32xbf16> to vector<32x32xf32>
    %5 = arith.subf %2, %4 : vector<32x32xf32>
    %6 = arith.truncf %5 : vector<32x32xf32> to vector<32x32xbf16>
    %7 = arith.extf %6 : vector<32x32xbf16> to vector<32x32xf32>
    %8 = arith.subf %5, %7 : vector<32x32xf32>
    %9 = arith.truncf %8 : vector<32x32xf32> to vector<32x32xbf16>
    %c0_3 = arith.constant 0 : index
    %c0_4 = arith.constant 0 : index
    %10 = vector.load %arg3[%c0_3, %c0_4] : memref<32x8xbf16, #tpu.memory_space<vmem>>, vector<32x8xbf16>
    %cst = arith.constant dense<0.000000e+00> : vector<32x8xf32>
    %11 = tpu.matmul %3, %10, %cst {dimension_numbers = #tpu.dot_dimension_numbers<[1], [0], [0], [1], [0, 0, 1, 1], [], []>} : vector<32x32xbf16>, vector<32x8xbf16>, vector<32x8xf32> -> vector<32x8xf32>
    %cst_5 = arith.constant dense<0.000000e+00> : vector<32x8xf32>
    %12 = tpu.matmul %6, %10, %cst_5 {dimension_numbers = #tpu.dot_dimension_numbers<[1], [0], [0], [1], [0, 0, 1, 1], [], []>} : vector<32x32xbf16>, vector<32x8xbf16>, vector<32x8xf32> -> vector<32x8xf32>
    %13 = arith.addf %11, %12 : vector<32x8xf32>
    %cst_6 = arith.constant dense<0.000000e+00> : vector<32x8xf32>
    %14 = tpu.matmul %9, %10, %cst_6 {dimension_numbers = #tpu.dot_dimension_numbers<[1], [0], [0], [1], [0, 0, 1, 1], [], []>} : vector<32x32xbf16>, vector<32x8xbf16>, vector<32x8xf32> -> vector<32x8xf32>
    %15 = arith.addf %13, %14 : vector<32x8xf32>
    %16 = vector.shape_cast %15 : vector<32x8xf32> to vector<4x8x8xf32>
    %c0_7 = arith.constant 0 : index
    %c0_8 = arith.constant 0 : index
    %17 = vector.load %arg4[%c0_7, %c0_8] : memref<32x8xbf16, #tpu.memory_space<vmem>>, vector<32x8xbf16>
    %cst_9 = arith.constant dense<0.000000e+00> : vector<32x8xf32>
    %18 = tpu.matmul %3, %17, %cst_9 {dimension_numbers = #tpu.dot_dimension_numbers<[1], [0], [0], [1], [0, 0, 1, 1], [], []>} : vector<32x32xbf16>, vector<32x8xbf16>, vector<32x8xf32> -> vector<32x8xf32>
    %cst_10 = arith.constant dense<0.000000e+00> : vector<32x8xf32>
    %19 = tpu.matmul %6, %17, %cst_10 {dimension_numbers = #tpu.dot_dimension_numbers<[1], [0], [0], [1], [0, 0, 1, 1], [], []>} : vector<32x32xbf16>, vector<32x8xbf16>, vector<32x8xf32> -> vector<32x8xf32>
    %20 = arith.addf %18, %19 : vector<32x8xf32>
    %cst_11 = arith.constant dense<0.000000e+00> : vector<32x8xf32>
    %21 = tpu.matmul %9, %17, %cst_11 {dimension_numbers = #tpu.dot_dimension_numbers<[1], [0], [0], [1], [0, 0, 1, 1], [], []>} : vector<32x32xbf16>, vector<32x8xbf16>, vector<32x8xf32> -> vector<32x8xf32>
    %22 = arith.addf %20, %21 : vector<32x8xf32>
    %23 = vector.shape_cast %22 : vector<32x8xf32> to vector<4x8x8xf32>
    %cst_12 = arith.constant dense<0xFF800000> : vector<8x8xf32>
    %24 = vector.multi_reduction <maximumf>, %23, %cst_12 [0] : vector<4x8x8xf32> to vector<8x8xf32>
    %25 = vector.shape_cast %24 : vector<8x8xf32> to vector<1x8x8xf32>
    %26 = vector.broadcast %25 : vector<1x8x8xf32> to vector<4x8x8xf32>
    %27 = arith.subf %23, %26 : vector<4x8x8xf32>
    %28 = math.exp %27 : vector<4x8x8xf32>
    %cst_13 = arith.constant dense<0.000000e+00> : vector<8x8xf32>
    %29 = vector.multi_reduction <add>, %28, %cst_13 [0] : vector<4x8x8xf32> to vector<8x8xf32>
    %30 = vector.shape_cast %29 : vector<8x8xf32> to vector<1x8x8xf32>
    %31 = vector.broadcast %30 : vector<1x8x8xf32> to vector<4x8x8xf32>
    %32 = arith.divf %28, %31 : vector<4x8x8xf32>
    %cst_14 = arith.constant 1.000000e+00 : f32
    %33 = vector.broadcast %cst_14 : f32 to vector<4x8x8xf32>
    %34 = arith.addf %33, %32 : vector<4x8x8xf32>
    %35 = arith.mulf %16, %34 : vector<4x8x8xf32>
    %c0_15 = arith.constant 0 : index
    %c0_16 = arith.constant 0 : index
    %c0_17 = arith.constant 0 : index
    %c0_18 = arith.constant 0 : index
    %36 = vector.load %arg5[%c0_15, %c0_16, %c0_17, %c0_18] : memref<1x4x8x8xf32, #tpu.memory_space<vmem>>, vector<1x4x8x8xf32>
    %37 = vector.shape_cast %36 : vector<1x4x8x8xf32> to vector<4x8x8xf32>
    %38 = vector.shape_cast %35 : vector<4x8x8xf32> to vector<1x4x8x8xf32>
    tpu.vector_store %arg5[%c0_15, %c0_16, %c0_17, %c0_18], %38 {strides = array<i32>} : memref<1x4x8x8xf32, #tpu.memory_space<vmem>>, vector<1x4x8x8xf32>,
    return
  }
  func.func @transform_0(%arg0: i32, %arg1: i32) -> (i32, i32, i32, i32) {
    %c0_i32 = arith.constant 0 : i32
    %c0_i32_0 = arith.constant 0 : i32
    %c0_i32_1 = arith.constant 0 : i32
    return %arg0, %c0_i32, %arg1, %c0_i32_0 : i32, i32, i32, i32
  }
  func.func @transform_1(%arg0: i32, %arg1: i32) -> (i32, i32) {
    %c0_i32 = arith.constant 0 : i32
    %c0_i32_0 = arith.constant 0 : i32
    %c0_i32_1 = arith.constant 0 : i32
    return %c0_i32, %c0_i32_0 : i32, i32
  }
  func.func @transform_2(%arg0: i32, %arg1: i32) -> (i32, i32) {
    %c0_i32 = arith.constant 0 : i32
    %c0_i32_0 = arith.constant 0 : i32
    %c0_i32_1 = arith.constant 0 : i32
    return %c0_i32, %c0_i32_0 : i32, i32
  }
  func.func @transform_3(%arg0: i32, %arg1: i32) -> (i32, i32, i32, i32) {
    %c0_i32 = arith.constant 0 : i32
    %c0_i32_0 = arith.constant 0 : i32
    %c0_i32_1 = arith.constant 0 : i32
    return %arg0, %c0_i32, %arg1, %c0_i32_0 : i32, i32, i32, i32
  }
}

</mosaic_0001>

<bundles_post_ra>
// kernel: tpu_custom_call.1
= control target key start
LH: loop header
LB: loop body
LE: loop exit
PB: predicated region body
PF: predicated region fallthrough
CT: control target
= control target key end

     0   :  { %8 = vsyncpa [#allocation3], 0  ;;  %s1030_s0 = inlined_call_operand.hbm [shape: f32[2,4,8,32], index: 0, kind: input, shape index: {}]   ;;  %s1031_s1 = inlined_call_operand.vmem [shape: bf16[32,8], index: 1, kind: input, shape index: {}]   ;;  %s1032_s2 = inlined_call_operand.vmem [shape: bf16[32,8], index: 2, kind: input, shape index: {}]   ;;  %s1033_s3 = inlined_call_operand.hbm [shape: f32[2,4,8,8], index: 3, kind: output, shape index: {}]  }
   0x1   :  { %10 = vsyncpa [#allocation3 + $0x1], 0 }
   0x2   :  { %11 = vsyncpa [#allocation4], 0 }
   0x3   :  { %13 = vsyncpa [#allocation4 + $0x1], 0  ;;  %s858_s12 = smov 0   ;;  %s860_s13 = smov 0  }
   0x4   :  { %s862_s14 = smov 0   ;;  %s864_s15 = smov 0  }
   0x5   :  { %s866_s16 = smov 0   ;;  %s868_s17 = smov 0  }
   0x6 LB: > { %s591_s18 = sadd.s32 4294967295, %s832_s17   ;;  %s592_s19 = sadd.s32 4294967294, %s832_s17   ;;  %s832_s17 = sphi %s868_s17, %s19_s17   ;;  %s828_s16 = sphi %s866_s16, %s1042_s16   ;;  %s824_s15 = sphi %s864_s15, %s1041_s15   ;;  %s820_s14 = sphi %s862_s14, %s1040_s14   ;;  %s816_s13 = sphi %s860_s13, %s1039_s13   ;;  %s812_s12 = sphi %s858_s12, %s1038_s12  }
   0x7   : > { %s31_s20 = sadd.s32 1, %s828_s16  ;;  %s40_s21 = sadd.s32 1, %s820_s14 }
   0x8   : > { %p33_p0 = scmp.ge.s32.totalorder %s31_s20, 2  ;;  %p47_p1 = scmp.ne.s32.totalorder %s820_s14, %s816_s13 }
   0x9   : > { %p48_p2 = scmp.eq.s32.totalorder %s832_s17, 0  ;;  %p53_p3 = scmp.ne.s32.totalorder %s816_s13, %s812_s12 }
   0xa   : > { %s1044_s20 = smov (%p33_p0, %s31_s20), 0  ;;  %p54_p5 = scmp.eq.s32.totalorder %s591_s18, 0 }
   0xb   : > { %p899_p4 = por %p48_p2, %p47_p1  ;;  %s35_s23 = ssub.s32 %s828_s16, %s1044_s20 }
   0xc   : > { %p121_p6 = scmp.eq.s32.totalorder %s591_s18, 1  ;;  %p38_p7 = scmp.eq.s32.totalorder %s35_s23, 0 }
   0xd   : > { %p905_p8 = por %p54_p5, %p53_p3  ;;  %p127_p10 = scmp.eq.s32.totalorder %s592_s19, 1 }
   0xe   : > { %p909_p9 = por %p121_p6, %p47_p1  ;;  %p594_p12 = scmp.ge.s32.totalorder %s832_s17, 2 }
   0xf   : > { %s914_s26 = scalar_select %p38_p7, %s820_s14, %s40_s21  }
  0x10   : > { %p916_p11 = por %p127_p10, %p53_p3  ;;  %p656_p13 = scmp.lt.s32.totalorder %s832_s17, 2 }
  0x11   : > { %s153_s28 = sand.u32 1, %s820_s14   ;;  %s634_s30 = sshll.u32 %s828_s16, 5 }
  0x12   : > { %s595_s29 = sshll.u32 %s153_s28, 5  ;;  %s163_s6 = scalar_lea.hbm %s1030_s0, %s634_s30 }
  0x13   : > { %s157_s7 = scalar_lea.vmem [#allocation2], %s595_s29  ;;  %s164_s9 = sshll.u32 %s163_s6, 4  ;;  %s165_s9 = int_to_ptr.hbm [resolvable:$true] %s164_s9 }
  0x14   : > { %s166_s8 = sshll.u32 %s157_s7, 4  ;;  %p649_p0 = pnand %p656_p13, %p899_p4  ;;  %s167_s8 = int_to_ptr.vmem [resolvable:$true] %s166_s8 }
  0x15   : > { %p598_p1 = scmp.ge.s32.totalorder %s832_s17, 1  ;;  %s154_s10 = scalar_lea.sflag [#allocation3], %s153_s28 }
  0x16   : > { %s834_s11 = smov 128   ;;  %s835_s18 = smov 8  }
  0x17   : > { %651 = dma.hbm_to_vmem [thread:$0]  (!%p649_p0), %s165_s9, 512, %s167_s8, %s154_s10, %s834_s11, %s834_s11, %s835_s18  }
  0x18   : > { %p174_p2 = scmp.lt.s32.totalorder %s832_s17, 3 }
  0x1a   : > { %p175_p3 = pnand %p598_p1, %p174_p2 }
  0x1b   : > { %s932_s19 = sand.u32 (!%p175_p3), 1, %s816_s13  }
  0x1c   : > { %178 = sbr.rel (%p175_p3) target bundleno = 274 (0x112), region = 32  ;;  %s599_s21 = sshll.u32 (!%p175_p3), %s932_s19, 5 }
  0x1d   : > { %s181_s23 = scalar_lea.sflag (!%p175_p3), [#allocation3], %s932_s19  ;;  %s184_s22 = scalar_lea.vmem (!%p175_p3), [#allocation2], %s599_s21 }
  0x21   : > { %803 = dma.done.wait (%p905_p8), %s181_s23, 512  }
  0x22   : > { %805 = vsyncadd (%p905_p8), %s181_s23, 4294966784  ;;  %v636_v0 = vld [vmem:[%s1031_s1 + $0x8] sm:$0xff]  ;;  %v209_v1 = vld [vmem:[%s184_s22] sm:$0xff]  ;;  %vm265_vm0 = vcmask 261120   ;;  %vm432_vm1 = vcmask 64512   ;;  %s639_s8 = sshll.u32 %s824_s15, 5 }
  0x23   : > { %v210_v2 = vld [vmem:[%s184_s22 + $0x8] sm:$0xff]  ;;  %v213_v3 = vpack.c.bf16 %v209_v1, %v209_v1  ;;  %v211_v4 = vld [vmem:[%s184_s22 + $0x10] sm:$0xff]  ;;  %v212_v5 = vld [vmem:[%s184_s22 + $0x18] sm:$0xff]  ;;  %313 = vmatpush.bf16.msra.mxu1 %v636_v0  ;;  %642 = vmatpush.bf16.msra.mxu3 %v636_v0  ;;  %s502_s11 = scalar_lea.hbm %s1033_s3, %s639_s8  ;;  %s207_s15 = scalar_lea.vmem [#allocation5], %s599_s21 }
  0x24   : > { %v635_v6 = vld [vmem:[%s1031_s1] sm:$0xff]  ;;  %v214_v7 = vpack.c.bf16 %v210_v2, %v210_v2  ;;  %v215_v8 = vpack.c.bf16 %v211_v4, %v211_v4  ;;  %v216_v9 = vpack.c.bf16 %v212_v5, %v212_v5  ;;  %278 = vmatpush.bf16.msra.mxu0 %v636_v0  ;;  %640 = vmatpush.bf16.msra.mxu2 %v636_v0  ;;  %v638_v16 = vld [vmem:[%s1032_s2 + $0x8] sm:$0xff]  ;;  %s503_s18 = sshll.u32 %s207_s15, 4  ;;  %s505_s23 = sshll.u32 %s502_s11, 4  ;;  %s504_s18 = int_to_ptr.vmem [resolvable:$true] %s503_s18  ;;  %s506_s23 = int_to_ptr.hbm [resolvable:$true] %s505_s23 }
  0x25   : > { %v217_v10 = vunpack.c.l.bf16 %v213_v3  ;;  %v295_v11 = vunpack.c.l.b16 %v213_v3  ;;  %v637_v28 = vld [vmem:[%s1032_s2] sm:$0xff]  ;;  %s490_s22 = scalar_lea.sflag [#allocation4], %s932_s19  ;;  %s764_s21 = sshra.s32 %s506_s23, 4  ;;  %s765_s21 = int_to_ptr.hbm [resolvable:$true] %s764_s21 }
  0x26   : > { %v218_v12 = vunpack.c.l.bf16 %v214_v7  ;;  %v296_v13 = vunpack.c.l.b16 %v214_v7  ;;  %v219_v14 = vunpack.c.l.bf16 %v215_v8  ;;  %v220_v15 = vunpack.c.l.bf16 %v216_v9  ;;  %s766_s28 = scalar_lea.hbm %s765_s21, 32  ;;  %s770_s4 = scalar_lea.hbm %s1033_s3, 64 }
  0x27   : > { %v297_v17 = vunpack.c.l.b16 %v215_v8  ;;  %v298_v18 = vunpack.c.l.b16 %v216_v9  ;;  %v221_v19 = vsub.f32 %v209_v1, %v217_v10  ;;  %314 = vmatpush.bf16.msra.mxu1 %v635_v6  ;;  %643 = vmatpush.bf16.msra.mxu3 %v635_v6  ;;  %p767_p4 = scmp.ne.s32.totalorder %s765_s21, %s766_s28  ;;  %p771_p7 = scmp.lt.s32.totalorder %s765_s21, %s1033_s3 }
  0x28   : > { %v299_v20 = vpack.c.b16 %v296_v13, %v295_v11  ;;  %v222_v21 = vsub.f32 %v210_v2, %v218_v12  ;;  %v223_v22 = vsub.f32 %v211_v4, %v219_v14  ;;  %279 = vmatpush.bf16.msra.mxu0 %v635_v6  ;;  %641 = vmatpush.bf16.msra.mxu2 %v635_v6  ;;  %p772_p8 = scmp.lt.s32.totalorder %s770_s4, %s766_s28 }
  0x29   : > { %v300_v23 = vpack.c.b16 %v298_v18, %v297_v17  ;;  %v225_v24 = vpack.c.bf16 %v221_v19, %v221_v19  ;;  %v224_v25 = vsub.f32 %v212_v5, %v220_v15  ;;  %p768_p5 = pnand %p767_p4, %p909_p9 }
  0x2a   : > { %v226_v26 = vpack.c.bf16 %v222_v21, %v222_v21  ;;  %v227_v27 = vpack.c.bf16 %v223_v22, %v223_v22  ;;  %611 = vmatmul.msk.bf16.vlgmr.msra.gmra.mxu1 %vm265_vm0, %v299_v20  ;;  %p773_p10 = por %p772_p8, %p771_p7 }
  0x2b   : > { %377 = vmatpush.bf16.msrb.mxu3 %v638_v16  ;;  %v247_v29 = vunpack.c.l.b16 %v225_v24  ;;  %v228_v30 = vpack.c.bf16 %v224_v25, %v224_v25  ;;  %415 = vmatpush.bf16.msrb.mxu1 %v638_v16  ;;  %v229_v35 = vunpack.c.l.bf16 %v225_v24  ;;  %p769_p6 = pneg %p768_p5 }
  0x2c   : > { %396 = vmatpush.bf16.msrb.mxu0 %v638_v16  ;;  %612 = vmatmul.msk.bf16.vlgmr.msra.gmra.mxu3 %vm265_vm0, %v300_v23  ;;  %v248_v31 = vunpack.c.l.b16 %v226_v26  ;;  %v249_v32 = vunpack.c.l.b16 %v227_v27  ;;  %v230_v36 = vunpack.c.l.bf16 %v226_v26  ;;  %v231_v41 = vunpack.c.l.bf16 %v227_v27 }
  0x2d   : > { %338 = vmatpush.bf16.msrb.mxu2 %v636_v0  ;;  %v250_v33 = vunpack.c.l.b16 %v228_v30  ;;  %v233_v38 = vsub.f32 %v221_v19, %v229_v35  ;;  %v232_v42 = vunpack.c.l.bf16 %v228_v30  ;;  %p774_p13 = pnand %p773_p10, %p769_p6 }
  0x2e   : > { %v251_v34 = vpack.c.b16 %v248_v31, %v247_v29  ;;  %v234_v39 = vsub.f32 %v222_v21, %v230_v36  ;;  %v235_v43 = vsub.f32 %v223_v22, %v231_v41 }
  0x2f   : > { %378 = vmatpush.bf16.msrb.mxu3 %v637_v28  ;;  %v252_v37 = vpack.c.b16 %v250_v33, %v249_v32  ;;  %416 = vmatpush.bf16.msrb.mxu1 %v637_v28  ;;  %v236_v44 = vsub.f32 %v224_v25, %v232_v42 }
  0x30   : > { %397 = vmatpush.bf16.msrb.mxu0 %v637_v28  ;;  %v237_v40 = vpack.c.bf16 %v234_v39, %v233_v38 }
  0x31   : > { %609 = vmatmul.msk.bf16.vlgmr.msra.gmra.mxu0 %vm265_vm0, %v251_v34  ;;  %610 = vmatmul.msk.bf16.vlgmr.msra.gmra.mxu2 %vm265_vm0, %v252_v37  ;;  %v238_v45 = vpack.c.bf16 %v236_v44, %v235_v43 }
  0x32   : > { %339 = vmatpush.bf16.msrb.mxu2 %v635_v6 }
  0x3a   : > { %627 = vmatmul.msk.bf16.vlgmr.msrb.gmra.mxu1 %vm265_vm0, %v237_v40 }
  0x3c   : > { %623 = vmatmul.msk.bf16.vlgmr.msrb.gmra.mxu3 %vm265_vm0, %v251_v34 }
  0x41   : > { %625 = vmatmul.msk.bf16.vlgmr.msrb.gmra.mxu0 %vm265_vm0, %v299_v20  ;;  %613 = vmatmul.msk.bf16.vlgmr.msrb.gmra.mxu2 %vm265_vm0, %v237_v40 }
  0x4a   : > { %628 = vmatmul.msk.bf16.gmra.mxu1 %vm265_vm0, %v238_v45 }
  0x4c   : > { %624 = vmatmul.msk.bf16.gmra.mxu3 %vm265_vm0, %v252_v37 }
  0x51   : > { %626 = vmatmul.msk.bf16.gmra.mxu0 %vm265_vm0, %v300_v23  ;;  %614 = vmatmul.msk.bf16.gmra.mxu2 %vm265_vm0, %v238_v45 }
  0xa7   : > { %v316_v46 = vpop.f32.mrf.mxu1 }
  0xae   : > { %v281_v47 = vpop.f32.mrf.mxu0 }
  0xaf   : > { %v966_v48 = vadd.f32 %v316_v46, %v281_v47  ;;  %v968_v49 = vpop.f32.mrf.mxu3  ;;  %v318_v50 = vpop.f32.mrf.mxu1 }
  0xb4   : > { %v286_v0 = vpop.f32.mrf.mxu2 }
  0xb6   : > { %v283_v51 = vpop.f32.mrf.mxu0 }
  0xb7   : > { %v970_v52 = vadd.f32 %v318_v50, %v283_v51  ;;  %v972_v53 = vpop.f32.mrf.mxu3  ;;  %v418_v54 = vpop.f32.mrf.mxu1 }
  0xbc   : > { %v288_v15 = vpop.f32.mrf.mxu2 }
  0xbe   : > { %v399_v55 = vpop.f32.mrf.mxu0 }
  0xbf   : > { %v380_v56 = vpop.f32.mrf.mxu3  ;;  %v420_v57 = vpop.f32.mrf.mxu1 }
  0xc0   : > { %v400_v1 = vadd.f32 %v399_v55, %v380_v56 }
  0xc2   : > { %v428_v6 = vadd.f32 %v418_v54, %v400_v1  ;;  %v322_v54 = vadd.f32 %v968_v49, %v286_v0 }
  0xc4   : > { %v433_v12 = vsel %vm432_vm1, %v428_v6, -inf  ;;  %v341_v27 = vpop.f32.mrf.mxu2 }
  0xc6   : > { %v401_v58 = vpop.f32.mrf.mxu0 }
  0xc7   : > { %v382_v59 = vpop.f32.mrf.mxu3  ;;  %v423_v61 = vpop.f32.mrf.mxu1 }
  0xc8   : > { %v402_v63 = vadd.f32 %v401_v58, %v382_v59 }
  0xca   : > { %v429_v3 = vadd.f32 %v420_v57, %v402_v63 }
  0xcc   : > { %v434_v10 = vsel %vm432_vm1, %v429_v3, -inf  ;;  %v343_v37 = vpop.f32.mrf.mxu2 }
  0xcd   : > { %v437_v16 = vmax.f32 %v433_v12, %v434_v10  ;;  %v352_v63 = vadd.f32 %v343_v37, %v970_v52 }
  0xce   : > { %v404_v60 = vpop.f32.mrf.mxu0 }
  0xcf   : > { %v385_v62 = vpop.f32.mrf.mxu3  ;;  %v425_v9 = vpop.f32.mrf.mxu1 }
  0xd0   : > { %v405_v2 = vadd.f32 %v404_v60, %v385_v62  ;;  %v351_v62 = vadd.f32 %v341_v27, %v966_v48 }
  0xd2   : > { %v430_v7 = vadd.f32 %v423_v61, %v405_v2  ;;  %v324_v61 = vadd.f32 %v972_v53, %v288_v15 }
  0xd4   : > { %v435_v13 = vsel %vm432_vm1, %v430_v7, -inf  ;;  %v346_v41 = vpop.f32.mrf.mxu2 }
  0xd5   : > { %v353_v1 = vadd.f32 %v346_v41, %v322_v54 }
  0xd6   : > { %v406_v4 = vpop.f32.mrf.mxu0 }
  0xd7   : > { %v387_v5 = vpop.f32.mrf.mxu3 }
  0xd8   : > { %v407_v8 = vadd.f32 %v406_v4, %v387_v5 }
  0xda   : > { %v431_v11 = vadd.f32 %v425_v9, %v407_v8 }
  0xdc   : > { %v436_v14 = vsel %vm432_vm1, %v431_v11, -inf  ;;  %v348_v56 = vpop.f32.mrf.mxu2 }
  0xdd   : > { %v438_v17 = vmax.f32 %v435_v13, %v436_v14  ;;  %v354_v4 = vadd.f32 %v348_v56, %v324_v61 }
  0xdf   : > { %v439_v18 = vmax.f32 %v437_v16, %v438_v17 }
  0xe1   : > { %v440_v19 = vsub.f32 %v428_v6, %v439_v18  ;;  %v441_v20 = vsub.f32 %v429_v3, %v439_v18  ;;  %v442_v21 = vsub.f32 %v430_v7, %v439_v18  ;;  %v443_v22 = vsub.f32 %v431_v11, %v439_v18 }
  0xe3   : > { %v444_v23 = vmul.f32 1.442695, %v440_v19  ;;  %v446_v24 = vmul.f32 1.442695, %v441_v20  ;;  %v448_v25 = vmul.f32 1.442695, %v442_v21 }
  0xe4   : > { %v450_v26 = vmul.f32 1.442695, %v443_v22 }
  0xe5   : > { %710 = vpow2.f32 %v444_v23 }
  0xe6   : > { %712 = vpow2.f32 %v446_v24 }
  0xe7   : > { %714 = vpow2.f32 %v448_v25 }
  0xe8   : > { %716 = vpow2.f32 %v450_v26 }
  0xeb   : > { %v711_v28 = vpop.eup %710 }
  0xec   : > { %v713_v29 = vpop.eup %712  ;;  %v452_v30 = vsel %vm432_vm1, %v711_v28, 0.0 }
  0xed   : > { %v715_v31 = vpop.eup %714  ;;  %v453_v32 = vsel %vm432_vm1, %v713_v29, 0.0 }
  0xee   : > { %v717_v33 = vpop.eup %716  ;;  %v454_v34 = vadd.f32 %v453_v32, %v452_v30  ;;  %v455_v35 = vsel %vm432_vm1, %v715_v31, 0.0 }
  0xef   : > { %v457_v38 = vsel %vm432_vm1, %v717_v33, 0.0 }
  0xf0   : > { %v456_v36 = vadd.f32 %v455_v35, %v454_v34 }
  0xf2   : > { %v458_v39 = vadd.f32 %v457_v38, %v456_v36 }
  0xf4   : > { %718 = vrcp.f32 %v458_v39  ;;  %v470_v44 = vand.u32 2147483648, %v458_v39  ;;  %v468_v46 = vand.u32 2147483647, %v458_v39  ;;  %vm464_vm3 = vweird.f32 %v458_v39 }
  0xf6   : > { %v471_v50 = vor.u32 1.1754944e-38, %v470_v44  ;;  %vm469_vm5 = vcmp.eq.f32.partialorder %v468_v46, 8.507059e+37 }
  0xfa   : > { %v719_v40 = vpop.eup %718 }
  0xfb   : > { %v460_v42 = vmul.f32 %v719_v40, %v458_v39  ;;  %vm465_vm2 = vweird.f32 %v719_v40 }
  0xfc   : > { %vm466_vm4 = vmor %vm464_vm3, %vm465_vm2 }
  0xfd   : > { %v461_v43 = vsub.f32 1.0, %v460_v42 }
  0xff   : > { %v462_v45 = vmul.f32 %v719_v40, %v461_v43 }
 0x101   : > { %v463_v47 = vadd.f32 %v719_v40, %v462_v45 }
 0x103   : > { %v467_v51 = vsel %vm466_vm4, %v719_v40, %v463_v47 }
 0x104   : > { %v472_v55 = vsel %vm469_vm5, %v471_v50, %v467_v51 }
 0x105   : > { %v473_v57 = vmul.f32 %v711_v28, %v472_v55  ;;  %v474_v58 = vmul.f32 %v713_v29, %v472_v55  ;;  %v475_v59 = vmul.f32 %v715_v31, %v472_v55  ;;  %v476_v60 = vmul.f32 %v717_v33, %v472_v55 }
 0x107   : > { %v477_v2 = vadd.f32 1.0, %v473_v57  ;;  %v478_v49 = vadd.f32 1.0, %v474_v58  ;;  %v479_v0 = vadd.f32 1.0, %v475_v59  ;;  %v480_v3 = vadd.f32 1.0, %v476_v60 }
 0x109   : > { %v481_v5 = vmul.f32 %v477_v2, %v351_v62  ;;  %v482_v6 = vmul.f32 %v478_v49, %v352_v63  ;;  %v483_v7 = vmul.f32 %v479_v0, %v353_v1  ;;  %v484_v53 = vmul.f32 %v480_v3, %v354_v4 }
 0x10b   : > { %485 = vst.msk [vmem:[%s207_s15] sm:$0xff] %vm432_vm1, %v481_v5 }
 0x10c   : > { %486 = vst.msk [vmem:[%s207_s15 + $0x8] sm:$0xff] %vm432_vm1, %v482_v6 }
 0x10d   : > { %487 = vst.msk [vmem:[%s207_s15 + $0x10] sm:$0xff] %vm432_vm1, %v483_v7 }
 0x10e   : > { %488 = vst.msk [vmem:[%s207_s15 + $0x18] sm:$0xff] %vm432_vm1, %v484_v53 }
 0x10f   : > { %777 = shalt.err (!%p774_p13)
}
 0x110   : > { %s836_s19 = smov 128   ;;  %s837_s6 = smov 8  }
 0x111   : > { %646 = dma.vmem_to_hbm [thread:$0]  (%p909_p9), %s504_s18, 512, %s506_s23, %s490_s22, %s836_s19, %s836_s19, %s837_s6  }
 0x112 PF: > { %s520_s7 = sand.u32 1, %s812_s12   ;;  %p653_p0 = pnand %p594_p12, %p916_p11 }
 0x113   : > { %s521_s8 = scalar_lea.sflag [#allocation4], %s520_s7 }
 0x114   : > { %p654_p1 = pneg %p653_p0 }
 0x116   : > { %807 = dma.done.wait (%p654_p1), %s521_s8, 512  }
 0x117   : > { %809 = vsyncadd (%p654_p1), %s521_s8, 4294966784  ;;  %s19_s17 = sadd.s32 1, %s832_s17   ;;  %s1038_s12 = smov %s816_s13 }
 0x118   : > { %p16_p2 = scmp.ge.s32.totalorder %s19_s17, 4   ;;  %s1039_s13 = smov %s820_s14 }
 0x119   : > { %s1040_s14 = smov %s914_s26  ;;  %s1041_s15 = smov %s828_s16 }
 0x11a   : > { %s1042_s16 = smov %s1044_s20  ;;  %18 = sbr.rel (!%p16_p2) target bundleno = 6 (0x6), region = 77 }
 0x11f   :  { %527 = vsyncpa [#allocation3], 1 }
 0x120   :  { %529 = vsyncpa [#allocation3 + $0x1], 1 }
 0x121   :  { %530 = vsyncpa [#allocation4], 1 }
 0x122   :  { %532 = vsyncpa [#allocation4 + $0x1], 1 }

</bundles_post_ra>
